<compile_context>
chip_gen: v6e
topology: v6e:2x2x1
jax: 0.10.0
libtpu: 0.0.40
codegen_flags: <defaults>
</compile_context>

<pallas_src>
import jax
import jax.numpy as jnp
from jax.experimental import pallas as pl
from jax.experimental.pallas import tpu as pltpu

EPS = 1e-6          # matches `eps = 1e-06` in the PyTorch module
_LANE = 128


def _round_up(x, m):
    return (x + m - 1) // m * m


def _choose_tile_b(batch):
    """One grid step whenever the working set trivially fits VMEM (grid steps
    are a serial loop on 1-TC v5e/v6e and cost ~0.35us each).  For very large
    batches pick the largest 128-row tile that exactly divides the 128-padded
    batch, so no grid step is wasted on padding rows."""
    if batch <= 2048:
        return batch                      # block == full batch dim (always legal)
    padded = _round_up(batch, _LANE)
    for t in (1024, 512, 256, 128):
        if padded % t == 0:
            return t
    return _LANE


def _make_kernel(with_action, emit_mu, emit_next, matmul_dtype):
    """Fused dynamics kernel: 2 MXU matmuls + EUP tanh + f32 residual."""

    def kernel(*refs):
        idx = 0
        x_ref = refs[idx]
        idx += 1
        a_ref = None
        if with_action:
            a_ref = refs[idx]
            idx += 1
        w1_ref, b1_ref, w2_ref, b2_ref = refs[idx:idx + 4]
        idx += 4
        mu_ref = ns_ref = None
        if emit_mu:
            mu_ref = refs[idx]
            idx += 1
        if emit_next:
            ns_ref = refs[idx]
            idx += 1

        x = x_ref[...]                                     # (TB, D) f32, original precision
        # hidden layer: bf16 MXU matmul with f32 accumulation, f32 bias, EUP tanh
        h = jnp.tanh(
            jnp.dot(x.astype(matmul_dtype), w1_ref[...],
                    preferred_element_type=jnp.float32)
            + b1_ref[...]
        )                                                  # (TB, H) f32
        # mu head (== network(state) == BaseDynamics.forward)
        mu = (
            jnp.dot(h.astype(matmul_dtype), w2_ref[...],
                    preferred_element_type=jnp.float32)
            + b2_ref[...]
        )                                                  # (TB, D) f32
        if emit_mu:
            mu_ref[...] = mu
        if emit_next:
            ns = mu + x                                    # full-precision residual
            if with_action:
                ns = ns + a_ref[...]                       # action stays f32
            ns_ref[...] = ns

    return kernel


def prepare_params(params, matmul_dtype=jnp.bfloat16):
    """One-time parameter preparation, OUTSIDE the per-step hot path:
    cast the MXU weight matrices to the matmul dtype, keep biases in f32, and
    precompute the state-independent var = softplus(log_var) + eps."""
    f32 = jnp.float32
    return {
        "w1": params["w1"].astype(matmul_dtype),
        "b1": params["b1"].astype(f32).reshape(1, -1),
        "w2": params["w2"].astype(matmul_dtype),
        "b2": params["b2"].astype(f32).reshape(1, -1),
        "var": jax.nn.softplus(params["log_var"].astype(f32)) + EPS,
    }


def _dynamics_pallas(prep, state, action, *, emit_mu, emit_next, tile_b=None):
    """Run the fused kernel; returns (mu_or_None, next_state_or_None)."""
    f32 = jnp.float32
    B, D = state.shape
    d_in, H = prep["w1"].shape
    assert d_in == D and prep["w2"].shape == (H, D)

    state = state.astype(f32)                       # no-op for f32 inputs
    with_action = emit_next and (action is not None)  # forward() ignores action
    if tile_b is None:
        tile_b = _choose_tile_b(B)
    grid = (pl.cdiv(B, tile_b),)

    # Unpadded batch blocks: last dim D equals the full array dim, so the
    # (8,128) rule is satisfied without any wrapper pad/slice HBM passes.
    batch_spec = pl.BlockSpec((tile_b, D), lambda i: (i, 0))

    # Constant-index weight/bias specs: a single resident VMEM buffer each
    # (no pointless double-buffering across grid steps).
    def const_spec(shape):
        return pl.BlockSpec(shape, lambda i: (0, 0),
                            pipeline_mode=pl.Buffered(buffer_count=1))

    in_specs = [batch_spec]
    inputs = [state]
    if with_action:
        in_specs.append(batch_spec)
        inputs.append(action.astype(f32))
    in_specs += [const_spec(prep["w1"].shape), const_spec(prep["b1"].shape),
                 const_spec(prep["w2"].shape), const_spec(prep["b2"].shape)]
    inputs += [prep["w1"], prep["b1"], prep["w2"], prep["b2"]]

    out_specs, out_shapes = [], []
    if emit_mu:
        out_specs.append(batch_spec)
        out_shapes.append(jax.ShapeDtypeStruct((B, D), f32))
    if emit_next:
        out_specs.append(batch_spec)
        out_shapes.append(jax.ShapeDtypeStruct((B, D), f32))

    outs = pl.pallas_call(
        _make_kernel(with_action, emit_mu, emit_next, prep["w1"].dtype),
        out_shape=tuple(out_shapes),
        grid=grid,
        in_specs=in_specs,
        out_specs=tuple(out_specs),
        compiler_params=pltpu.CompilerParams(
            # TODO(synk): pltpu.CORE_PARALLEL here for true 2-TC sharding on v7x.
            dimension_semantics=("parallel",),
        ),
    )(*inputs)

    outs = list(outs)
    mu = outs.pop(0) if emit_mu else None
    ns = outs.pop(0) if emit_next else None
    return mu, ns


# ----- BaseDynamics API -------------------------------------------------------

def base_dynamics_forward(prep, state, action=None, **kw):
    """BaseDynamics.forward: mu = network(state).  (action is unused, as in the module.)"""
    mu, _ = _dynamics_pallas(prep, state, None, emit_mu=True, emit_next=False, **kw)
    return mu


def base_dynamics_compute_param(prep, state, **kw):
    """BaseDynamics.compute_param: (mu, var)."""
    mu, _ = _dynamics_pallas(prep, state, None, emit_mu=True, emit_next=False, **kw)
    return mu, prep["var"]


def base_dynamics_sample_forward(prep, state, action=None, **kw):
    """BaseDynamics.sample_forward: (next_state, var) with next_state = mu + state (+ action)."""
    _, ns = _dynamics_pallas(prep, state, action, emit_mu=False, emit_next=True, **kw)
    return ns, prep["var"]


def base_dynamics_apply(prep, state, action=None, **kw):
    """Combined pass returning (mu, next_state, var) from a single kernel launch."""
    mu, ns = _dynamics_pallas(prep, state, action, emit_mu=True, emit_next=True, **kw)
    return mu, ns, prep["var"]


def init_params(key, state_dim, hidden_dim):
    """Deterministic synthetic init (the base class loads no checkpoint)."""
    k1, k2, k3, k4, k5 = jax.random.split(key, 5)
    return {
        "w1": jax.random.normal(k1, (state_dim, hidden_dim), jnp.float32) / jnp.sqrt(state_dim),
        "b1": 0.1 * jax.random.normal(k2, (1, hidden_dim), jnp.float32),
        "w2": jax.random.normal(k3, (hidden_dim, state_dim), jnp.float32) / jnp.sqrt(hidden_dim),
        "b2": 0.1 * jax.random.normal(k4, (1, state_dim), jnp.float32),
        # matches nn.Parameter(-2 * torch.rand(1, state_dim))
        "log_var": -2.0 * jax.random.uniform(k5, (1, state_dim), jnp.float32),
    }


if __name__ == "__main__":
    # Small shapes consistent with the module: batch 256, state_dim 16, hidden 128.
    B, D, H = 256, 16, 128

    key = jax.random.PRNGKey(0)
    k_param, k_x, k_a = jax.random.split(key, 3)
    params = init_params(k_param, D, H)
    prep = prepare_params(params)                       # one-time, outside hot path

    state = jax.random.normal(k_x, (B, D), jnp.float32)
    action = 0.1 * jax.random.normal(k_a, (B, D), jnp.float32)

    # Combined pass: one kernel launch, both outputs (single grid step).
    mu, next_state, var = base_dynamics_apply(prep, state, action)
    jax.block_until_ready((mu, next_state, var))

    # Single-output entry points: only the needed output is stored.
    mu_only = base_dynamics_forward(prep, state)                      # forward()
    ns_only, var2 = base_dynamics_sample_forward(prep, state, action)  # sample_forward()
    jax.block_until_ready((mu_only, ns_only, var2))

    # Multi-step grid smoke test (2 x 128-row tiles, exact division).
    mu_t, ns_t, _ = base_dynamics_apply(prep, state, action, tile_b=128)
    jax.block_until_ready((mu_t, ns_t))

    # Plain-JAX reference: identical bf16 matmul-operand casts (MXU semantics),
    # but the residual uses the original f32 state/action exactly like the
    # PyTorch module.
    mm = jnp.bfloat16
    w1q, w2q = params["w1"].astype(mm), params["w2"].astype(mm)
    h_ref = jnp.tanh(jnp.dot(state.astype(mm), w1q,
                             preferred_element_type=jnp.float32) + params["b1"])
    mu_ref = jnp.dot(h_ref.astype(mm), w2q,
                     preferred_element_type=jnp.float32) + params["b2"]
    var_ref = jax.nn.softplus(params["log_var"]) + EPS
    ns_ref = mu_ref + state + action                    # full-precision residual

    assert mu.shape == (B, D) and next_state.shape == (B, D) and var.shape == (1, D)
    tol = dict(atol=5e-3, rtol=5e-3)
    assert jnp.allclose(mu, mu_ref, **tol), "mu mismatch"
    assert jnp.allclose(next_state, ns_ref, **tol), "next_state mismatch"
    assert jnp.allclose(mu_only, mu_ref, **tol), "forward() mismatch"
    assert jnp.allclose(ns_only, ns_ref, **tol), "sample_forward() mismatch"
    assert jnp.allclose(mu_t, mu_ref, **tol), "tiled-grid mu mismatch"
    assert jnp.allclose(ns_t, ns_ref, **tol), "tiled-grid next_state mismatch"
    assert jnp.allclose(var, var_ref) and jnp.allclose(var2, var_ref), "var mismatch"
    assert bool(jnp.all(var > 0)), "softplus(log_var)+eps must be positive"

    print("KERNEL_OK")
</pallas_src>

<mosaic_0001>
module attributes {stable_mosaic.version = 11 : i64} {
  func.func @kernel(%arg0: i32, %arg1: memref<256x16xf32, #tpu.memory_space<vmem>>, %arg2: memref<256x16xf32, #tpu.memory_space<vmem>>, %arg3: memref<16x128xbf16, #tpu.memory_space<vmem>>, %arg4: memref<1x128xf32, #tpu.memory_space<vmem>>, %arg5: memref<128x16xbf16, #tpu.memory_space<vmem>>, %arg6: memref<1x16xf32, #tpu.memory_space<vmem>>, %arg7: memref<256x16xf32, #tpu.memory_space<vmem>>, %arg8: memref<256x16xf32, #tpu.memory_space<vmem>>) attributes {dimension_semantics = [#tpu.dimension_semantics<parallel>], iteration_bounds = array<i64: 1>, scalar_prefetch = 0 : i64, scratch_operands = 0 : i64, tpu.core_type = #tpu.core_type<tc>, window_params = [{transform_indices = @transform_0, window_bounds = array<i64: 256, 16>}, {transform_indices = @transform_1, window_bounds = array<i64: 256, 16>}, {pipeline_mode = #tpu.pipeline_mode<synchronous>, transform_indices = @transform_2, window_bounds = array<i64: 16, 128>}, {pipeline_mode = #tpu.pipeline_mode<synchronous>, transform_indices = @transform_3, window_bounds = array<i64: 1, 128>}, {pipeline_mode = #tpu.pipeline_mode<synchronous>, transform_indices = @transform_4, window_bounds = array<i64: 128, 16>}, {pipeline_mode = #tpu.pipeline_mode<synchronous>, transform_indices = @transform_5, window_bounds = array<i64: 1, 16>}, {transform_indices = @transform_6, window_bounds = array<i64: 256, 16>}, {transform_indices = @transform_7, window_bounds = array<i64: 256, 16>}]} {
    %c0 = arith.constant 0 : index
    %c0_0 = arith.constant 0 : index
    %0 = vector.load %arg1[%c0, %c0_0] : memref<256x16xf32, #tpu.memory_space<vmem>>, vector<256x16xf32>
    %1 = arith.truncf %0 : vector<256x16xf32> to vector<256x16xbf16>
    %c0_1 = arith.constant 0 : index
    %c0_2 = arith.constant 0 : index
    %2 = vector.load %arg3[%c0_1, %c0_2] : memref<16x128xbf16, #tpu.memory_space<vmem>>, vector<16x128xbf16>
    %cst = arith.constant dense<0.000000e+00> : vector<256x128xf32>
    %3 = tpu.matmul %1, %2, %cst {dimension_numbers = #tpu.dot_dimension_numbers<[1], [0], [0], [1], [0, 0, 1, 1], [], []>} : vector<256x16xbf16>, vector<16x128xbf16>, vector<256x128xf32> -> vector<256x128xf32>
    %c0_3 = arith.constant 0 : index
    %c0_4 = arith.constant 0 : index
    %4 = vector.load %arg4[%c0_3, %c0_4] : memref<1x128xf32, #tpu.memory_space<vmem>>, vector<1x128xf32>
    %5 = vector.broadcast %4 : vector<1x128xf32> to vector<256x128xf32>
    %6 = arith.addf %3, %5 : vector<256x128xf32>
    %7 = math.tanh %6 : vector<256x128xf32>
    %8 = arith.truncf %7 : vector<256x128xf32> to vector<256x128xbf16>
    %c0_5 = arith.constant 0 : index
    %c0_6 = arith.constant 0 : index
    %9 = vector.load %arg5[%c0_5, %c0_6] : memref<128x16xbf16, #tpu.memory_space<vmem>>, vector<128x16xbf16>
    %cst_7 = arith.constant dense<0.000000e+00> : vector<256x16xf32>
    %10 = tpu.matmul %8, %9, %cst_7 {dimension_numbers = #tpu.dot_dimension_numbers<[1], [0], [0], [1], [0, 0, 1, 1], [], []>} : vector<256x128xbf16>, vector<128x16xbf16>, vector<256x16xf32> -> vector<256x16xf32>
    %c0_8 = arith.constant 0 : index
    %c0_9 = arith.constant 0 : index
    %11 = vector.load %arg6[%c0_8, %c0_9] : memref<1x16xf32, #tpu.memory_space<vmem>>, vector<1x16xf32>
    %12 = vector.broadcast %11 : vector<1x16xf32> to vector<256x16xf32>
    %13 = arith.addf %10, %12 : vector<256x16xf32>
    %c0_10 = arith.constant 0 : index
    %c0_11 = arith.constant 0 : index
    %14 = vector.load %arg7[%c0_10, %c0_11] : memref<256x16xf32, #tpu.memory_space<vmem>>, vector<256x16xf32>
    tpu.vector_store %arg7[%c0_10, %c0_11], %13 {strides = array<i32>} : memref<256x16xf32, #tpu.memory_space<vmem>>, vector<256x16xf32>,
    %15 = arith.addf %13, %0 : vector<256x16xf32>
    %c0_12 = arith.constant 0 : index
    %c0_13 = arith.constant 0 : index
    %16 = vector.load %arg2[%c0_12, %c0_13] : memref<256x16xf32, #tpu.memory_space<vmem>>, vector<256x16xf32>
    %17 = arith.addf %15, %16 : vector<256x16xf32>
    %c0_14 = arith.constant 0 : index
    %c0_15 = arith.constant 0 : index
    %18 = vector.load %arg8[%c0_14, %c0_15] : memref<256x16xf32, #tpu.memory_space<vmem>>, vector<256x16xf32>
    tpu.vector_store %arg8[%c0_14, %c0_15], %17 {strides = array<i32>} : memref<256x16xf32, #tpu.memory_space<vmem>>, vector<256x16xf32>,
    return
  }
  func.func @transform_0(%arg0: i32) -> (i32, i32) {
    %c0_i32 = arith.constant 0 : i32
    %c0_i32_0 = arith.constant 0 : i32
    return %arg0, %c0_i32 : i32, i32
  }
  func.func @transform_1(%arg0: i32) -> (i32, i32) {
    %c0_i32 = arith.constant 0 : i32
    %c0_i32_0 = arith.constant 0 : i32
    return %arg0, %c0_i32 : i32, i32
  }
  func.func @transform_2(%arg0: i32) -> (i32, i32) {
    %c0_i32 = arith.constant 0 : i32
    %c0_i32_0 = arith.constant 0 : i32
    %c0_i32_1 = arith.constant 0 : i32
    return %c0_i32, %c0_i32_0 : i32, i32
  }
  func.func @transform_3(%arg0: i32) -> (i32, i32) {
    %c0_i32 = arith.constant 0 : i32
    %c0_i32_0 = arith.constant 0 : i32
    %c0_i32_1 = arith.constant 0 : i32
    return %c0_i32, %c0_i32_0 : i32, i32
  }
  func.func @transform_4(%arg0: i32) -> (i32, i32) {
    %c0_i32 = arith.constant 0 : i32
    %c0_i32_0 = arith.constant 0 : i32
    %c0_i32_1 = arith.constant 0 : i32
    return %c0_i32, %c0_i32_0 : i32, i32
  }
  func.func @transform_5(%arg0: i32) -> (i32, i32) {
    %c0_i32 = arith.constant 0 : i32
    %c0_i32_0 = arith.constant 0 : i32
    %c0_i32_1 = arith.constant 0 : i32
    return %c0_i32, %c0_i32_0 : i32, i32
  }
  func.func @transform_6(%arg0: i32) -> (i32, i32) {
    %c0_i32 = arith.constant 0 : i32
    %c0_i32_0 = arith.constant 0 : i32
    return %arg0, %c0_i32 : i32, i32
  }
  func.func @transform_7(%arg0: i32) -> (i32, i32) {
    %c0_i32 = arith.constant 0 : i32
    %c0_i32_0 = arith.constant 0 : i32
    return %arg0, %c0_i32 : i32, i32
  }
}

</mosaic_0001>

<bundles_post_ra>
// kernel: tpu_custom_call.1
= control target key start
LH: loop header
LB: loop body
LE: loop exit
PB: predicated region body
PF: predicated region fallthrough
CT: control target
= control target key end

     0   :  { %vm89_vm0 = vcmask 130048   ;;  %s1719_s2 = inlined_call_operand.vmem [shape: bf16[16,128], index: 2, kind: input, shape index: {}]   ;;  %s1720_s0 = inlined_call_operand.vmem [shape: f32[256,16], index: 0, kind: input, shape index: {}]   ;;  %s1721_s4 = inlined_call_operand.vmem [shape: bf16[128,16], index: 4, kind: input, shape index: {}]   ;;  %s1722_s3 = inlined_call_operand.vmem [shape: f32[1,128], index: 3, kind: input, shape index: {}]   ;;  %s1723_s5 = inlined_call_operand.vmem [shape: f32[1,16], index: 5, kind: input, shape index: {}]   ;;  %s1724_s1 = inlined_call_operand.vmem [shape: f32[256,16], index: 1, kind: input, shape index: {}]   ;;  %s1725_s6 = inlined_call_operand.vmem [shape: f32[256,16], index: 6, kind: output, shape index: {0}]   ;;  %s1726_s7 = inlined_call_operand.vmem [shape: f32[256,16], index: 7, kind: output, shape index: {1}]  }
   0x1   :  { %v913_v0 = vld [vmem:[%s1719_s2] sm:$0xff]   ;;  %v1037_v2 = vld [vmem:[%s1720_s0 + $0x8] sm:$0xff]  ;;  %v1042_v3 = vld [vmem:[%s1720_s0 + $0x10] sm:$0xff] }
   0x2   :  { %v1032_v1 = vld [vmem:[%s1720_s0] sm:$0xff]  ;;  %815 = vmatprep.subr.bf16.mxu0 %v913_v0  ;;  %v1049_v5 = vld [vmem:[%s1720_s0 + $0x18] sm:$0xff]  ;;  %v1059_v7 = vld [vmem:[%s1720_s0 + $0x28] sm:$0xff] }
   0x3   :  { %v58_v4 = vpack.c.bf16 %v1037_v2, %v1032_v1  ;;  %v1054_v6 = vld [vmem:[%s1720_s0 + $0x20] sm:$0xff]  ;;  %816 = vmatpush3.bf16.msra.mxu0 %v913_v0  ;;  %v59_v8 = vpack.c.bf16 %v1049_v5, %v1042_v3  ;;  %v1071_v10 = vld [vmem:[%s1720_s0 + $0x30] sm:$0xff]  ;;  %v1076_v11 = vld [vmem:[%s1720_s0 + $0x38] sm:$0xff] }
   0x4   :  { %v60_v9 = vpack.c.bf16 %v1059_v7, %v1054_v6  ;;  %v1081_v12 = vld [vmem:[%s1720_s0 + $0x40] sm:$0xff]  ;;  %v1086_v13 = vld [vmem:[%s1720_s0 + $0x48] sm:$0xff]  ;;  %v61_v14 = vpack.c.bf16 %v1076_v11, %v1071_v10  ;;  %v914_v16 = vld [vmem:[%s1721_s4 + $0x38] sm:$0xff]  }
   0x5   :  { %817 = vmatprep.mubr.msk.bf16.mxu0 %vm89_vm0, %v58_v4  ;;  %v62_v15 = vpack.c.bf16 %v1086_v13, %v1081_v12  ;;  %v1098_v17 = vld [vmem:[%s1720_s0 + $0x50] sm:$0xff]  ;;  %v1103_v18 = vld [vmem:[%s1720_s0 + $0x58] sm:$0xff]  ;;  %v1112_v20 = vld [vmem:[%s1720_s0 + $0x60] sm:$0xff]  ;;  %849 = vmatprep.subr.bf16.mxu0 %v914_v16 }
   0x6   :  { %818 = vmatmul.mubr.msk.bf16.vlgmr.msra.gmra.mxu0 %vm89_vm0, %v59_v8  ;;  %v915_v19 = vld [vmem:[%s1721_s4 + $0x30] sm:$0xff]   ;;  %v1117_v21 = vld [vmem:[%s1720_s0 + $0x68] sm:$0xff]  ;;  %897 = vmatprep.subr.bf16.mxu1 %v914_v16  ;;  %v63_v22 = vpack.c.bf16 %v1103_v18, %v1098_v17  ;;  %v1134_v25 = vld [vmem:[%s1720_s0 + $0x78] sm:$0xff] }
   0x7   :  { %821 = vmatprep.mubr.msk.bf16.mxu0 %vm89_vm0, %v60_v9  ;;  %850 = vmatpush3.bf16.msra.mxu0 %v914_v16  ;;  %v64_v23 = vpack.c.bf16 %v1117_v21, %v1112_v20  ;;  %v1129_v24 = vld [vmem:[%s1720_s0 + $0x70] sm:$0xff]  ;;  %v1139_v26 = vld [vmem:[%s1720_s0 + $0x80] sm:$0xff]  ;;  %v1144_v27 = vld [vmem:[%s1720_s0 + $0x88] sm:$0xff] }
   0x8   :  { %851 = vmatprep.subr.bf16.mxu0 %v915_v19  ;;  %905 = vmatpush3.bf16.msra.mxu1 %v914_v16  ;;  %v65_v28 = vpack.c.bf16 %v1134_v25, %v1129_v24  ;;  %v66_v29 = vpack.c.bf16 %v1144_v27, %v1139_v26  ;;  %v1155_v30 = vld [vmem:[%s1720_s0 + $0x90] sm:$0xff]  ;;  %v1160_v31 = vld [vmem:[%s1720_s0 + $0x98] sm:$0xff]  ;;  %v1165_v32 = vld [vmem:[%s1720_s0 + $0xa0] sm:$0xff] }
   0x9   :  { %898 = vmatprep.subr.bf16.mxu1 %v915_v19  ;;  %v1170_v33 = vld [vmem:[%s1720_s0 + $0xa8] sm:$0xff]  ;;  %v67_v34 = vpack.c.bf16 %v1160_v31, %v1155_v30  ;;  %v1181_v36 = vld [vmem:[%s1720_s0 + $0xb0] sm:$0xff]  ;;  %v1186_v37 = vld [vmem:[%s1720_s0 + $0xb8] sm:$0xff] }
   0xa   :  { %v68_v35 = vpack.c.bf16 %v1170_v33, %v1165_v32  ;;  %v1191_v38 = vld [vmem:[%s1720_s0 + $0xc0] sm:$0xff]  ;;  %v1196_v39 = vld [vmem:[%s1720_s0 + $0xc8] sm:$0xff]  ;;  %v69_v40 = vpack.c.bf16 %v1186_v37, %v1181_v36  ;;  %v1207_v42 = vld [vmem:[%s1720_s0 + $0xd0] sm:$0xff] }
   0xb   :  { %852 = vmatpush3.bf16.msra.mxu0 %v915_v19  ;;  %v70_v41 = vpack.c.bf16 %v1196_v39, %v1191_v38  ;;  %v1212_v43 = vld [vmem:[%s1720_s0 + $0xd8] sm:$0xff]  ;;  %v1217_v44 = vld [vmem:[%s1720_s0 + $0xe0] sm:$0xff]  ;;  %v1222_v45 = vld [vmem:[%s1720_s0 + $0xe8] sm:$0xff] }
   0xc   :  { %906 = vmatpush3.bf16.msra.mxu1 %v915_v19  ;;  %v71_v46 = vpack.c.bf16 %v1212_v43, %v1207_v42  ;;  %v72_v47 = vpack.c.bf16 %v1222_v45, %v1217_v44  ;;  %v1233_v48 = vld [vmem:[%s1720_s0 + $0xf0] sm:$0xff]  ;;  %v1238_v49 = vld [vmem:[%s1720_s0 + $0xf8] sm:$0xff]  ;;  %v916_v51 = vld [vmem:[%s1721_s4 + $0x28] sm:$0xff]  }
   0xd   :  { %v73_v50 = vpack.c.bf16 %v1238_v49, %v1233_v48  ;;  %853 = vmatprep.subr.bf16.mxu0 %v916_v51  ;;  %899 = vmatprep.subr.bf16.mxu1 %v916_v51  ;;  %v917_v52 = vld [vmem:[%s1721_s4 + $0x20] sm:$0xff]   ;;  %v918_v53 = vld [vmem:[%s1721_s4 + $0x18] sm:$0xff]   ;;  %v919_v54 = vld [vmem:[%s1721_s4 + $0x10] sm:$0xff]  }
   0xe   :  { %822 = vmatmul.mubr.msk.bf16.gmra.mxu0 %vm89_vm0, %v61_v14  ;;  %v920_v55 = vld [vmem:[%s1721_s4 + $0x8] sm:$0xff]   ;;  %v921_v56 = vld [vmem:[%s1721_s4] sm:$0xff]  }
   0xf   :  { %825 = vmatprep.mubr.msk.bf16.mxu0 %vm89_vm0, %v62_v15  ;;  %854 = vmatpush3.bf16.msra.mxu0 %v916_v51  ;;  %v1264_v58 = vld [vmem:[%s1722_s3] ss:$0 sm:$0xff] }
  0x10   :  { %907 = vmatpush3.bf16.msra.mxu1 %v916_v51  ;;  %855 = vmatprep.subr.bf16.mxu0 %v917_v52 }
  0x11   :  { %900 = vmatprep.subr.bf16.mxu1 %v917_v52 }
  0x13   :  { %856 = vmatpush3.bf16.msra.mxu0 %v917_v52 }
  0x14   :  { %908 = vmatpush3.bf16.msra.mxu1 %v917_v52  ;;  %857 = vmatprep.subr.bf16.mxu0 %v918_v53 }
  0x15   :  { %901 = vmatprep.subr.bf16.mxu1 %v918_v53 }
  0x16   :  { %826 = vmatmul.mubr.msk.bf16.gmra.mxu0 %vm89_vm0, %v63_v22 }
  0x17   :  { %829 = vmatprep.mubr.msk.bf16.mxu0 %vm89_vm0, %v64_v23  ;;  %858 = vmatpush3.bf16.msra.mxu0 %v918_v53 }
  0x18   :  { %909 = vmatpush3.bf16.msra.mxu1 %v918_v53  ;;  %859 = vmatprep.subr.bf16.mxu0 %v919_v54 }
  0x19   :  { %902 = vmatprep.subr.bf16.mxu1 %v919_v54 }
  0x1b   :  { %860 = vmatpush3.bf16.msra.mxu0 %v919_v54 }
  0x1c   :  { %910 = vmatpush3.bf16.msra.mxu1 %v919_v54  ;;  %861 = vmatprep.subr.bf16.mxu0 %v920_v55 }
  0x1d   :  { %903 = vmatprep.subr.bf16.mxu1 %v920_v55 }
  0x1e   :  { %830 = vmatmul.mubr.msk.bf16.gmra.mxu0 %vm89_vm0, %v65_v28 }
  0x1f   :  { %833 = vmatprep.mubr.msk.bf16.mxu0 %vm89_vm0, %v66_v29  ;;  %862 = vmatpush3.bf16.msra.mxu0 %v920_v55 }
  0x20   :  { %911 = vmatpush3.bf16.msra.mxu1 %v920_v55  ;;  %863 = vmatprep.subr.bf16.mxu0 %v921_v56 }
  0x21   :  { %904 = vmatprep.subr.bf16.mxu1 %v921_v56 }
  0x23   :  { %864 = vmatpush3.bf16.msra.mxu0 %v921_v56 }
  0x24   :  { %912 = vmatpush3.bf16.msra.mxu1 %v921_v56 }
  0x26   :  { %834 = vmatmul.mubr.msk.bf16.gmra.mxu0 %vm89_vm0, %v67_v34 }
  0x27   :  { %837 = vmatprep.mubr.msk.bf16.mxu0 %vm89_vm0, %v68_v35 }
  0x2e   :  { %838 = vmatmul.mubr.msk.bf16.gmra.mxu0 %vm89_vm0, %v69_v40 }
  0x2f   :  { %841 = vmatprep.mubr.msk.bf16.mxu0 %vm89_vm0, %v70_v41 }
  0x36   :  { %842 = vmatmul.mubr.msk.bf16.gmra.mxu0 %vm89_vm0, %v71_v46 }
  0x37   :  { %845 = vmatprep.mubr.msk.bf16.mxu0 %vm89_vm0, %v72_v47 }
  0x3e   :  { %846 = vmatmul.mubr.msk.bf16.gmra.mxu0 %vm89_vm0, %v73_v50 }
  0xc6   :  { %v819_v57 = vpop.f32.mrf.mxu0 }
  0xc7   :  { %v181_v63 = vadd.f32 %v819_v57, %v1264_v58 }
  0xc8   :  { %v172_v59 = vpop.f32.mrf.mxu0 }
  0xc9   :  { %v173_v60 = vadd.f32 %v1264_v58, %v172_v59 }
  0xca   :  { %v820_v61 = vpop.f32.mrf.mxu0 }
  0xcb   :  { %v184_v62 = vadd.f32 %v820_v61, %v1264_v58  ;;  %922 = vtanh.f32 %v173_v60 }
  0xcc   :  { %v175_v0 = vpop.f32.mrf.mxu0 }
  0xcd   :  { %v176_v4 = vadd.f32 %v1264_v58, %v175_v0  ;;  %924 = vtanh.f32 %v184_v62 }
  0xce   :  { %v823_v8 = vpop.f32.mrf.mxu0 }
  0xcf   :  { %926 = vtanh.f32 %v176_v4  ;;  %v197_v19 = vadd.f32 %v823_v8, %v1264_v58 }
  0xd0   :  { %928 = vtanh.f32 %v181_v63  ;;  %v188_v9 = vpop.f32.mrf.mxu0 }
  0xd1   :  { %v189_v14 = vadd.f32 %v1264_v58, %v188_v9 }
  0xd2   :  { %v824_v15 = vpop.f32.mrf.mxu0 }
  0xd3   :  { %v200_v16 = vadd.f32 %v824_v15, %v1264_v58  ;;  %930 = vtanh.f32 %v189_v14 }
  0xd4   :  { %v191_v22 = vpop.f32.mrf.mxu0 }
  0xd5   :  { %v192_v23 = vadd.f32 %v1264_v58, %v191_v22  ;;  %932 = vtanh.f32 %v200_v16 }
  0xd6   :  { %v827_v28 = vpop.f32.mrf.mxu0 }
  0xd7   :  { %934 = vtanh.f32 %v192_v23  ;;  %v213_v50 = vadd.f32 %v827_v28, %v1264_v58 }
  0xd8   :  { %936 = vtanh.f32 %v197_v19  ;;  %v204_v29 = vpop.f32.mrf.mxu0  ;;  %v923_v35 = vpop.eup %922 }
  0xd9   :  { %v205_v34 = vadd.f32 %v1264_v58, %v204_v29 }
  0xda   :  { %v828_v40 = vpop.f32.mrf.mxu0  ;;  %v925_v41 = vpop.eup %924 }
  0xdb   :  { %v216_v46 = vadd.f32 %v828_v40, %v1264_v58  ;;  %938 = vtanh.f32 %v205_v34 }
  0xdc   :  { %v927_v47 = vpop.eup %926  ;;  %v207_v51 = vpop.f32.mrf.mxu0 }
  0xdd   :  { %v929_v52 = vpop.eup %928  ;;  %v208_v53 = vadd.f32 %v1264_v58, %v207_v51  ;;  %v331_v54 = vpack.c.bf16 %v927_v47, %v923_v35  ;;  %940 = vtanh.f32 %v216_v46 }
  0xde   :  { %v831_v55 = vpop.f32.mrf.mxu0  ;;  %v332_v56 = vpack.c.bf16 %v925_v41, %v929_v52 }
  0xdf   :  { %942 = vtanh.f32 %v208_v53  ;;  %865 = vmatprep.mubr.bf16.mxu0 %v331_v54  ;;  %v229_v4 = vadd.f32 %v831_v55, %v1264_v58 }
  0xe0   :  { %944 = vtanh.f32 %v213_v50  ;;  %v220_v57 = vpop.f32.mrf.mxu0  ;;  %866 = vmatmul.mubr.bf16.vlgmr.msra.gmra.mxu0 %v332_v56  ;;  %v931_v60 = vpop.eup %930 }
  0xe1   :  { %v221_v59 = vadd.f32 %v1264_v58, %v220_v57 }
  0xe2   :  { %v832_v61 = vpop.f32.mrf.mxu0  ;;  %v933_v62 = vpop.eup %932 }
  0xe3   :  { %v232_v63 = vadd.f32 %v832_v61, %v1264_v58  ;;  %946 = vtanh.f32 %v221_v59 }
  0xe4   :  { %v935_v0 = vpop.eup %934  ;;  %v223_v8 = vpop.f32.mrf.mxu0 }
  0xe5   :  { %v937_v9 = vpop.eup %936  ;;  %v224_v14 = vadd.f32 %v1264_v58, %v223_v8  ;;  %v333_v15 = vpack.c.bf16 %v935_v0, %v931_v60  ;;  %948 = vtanh.f32 %v232_v63 }
  0xe6   :  { %v835_v16 = vpop.f32.mrf.mxu0  ;;  %v334_v19 = vpack.c.bf16 %v933_v62, %v937_v9 }
  0xe7   :  { %950 = vtanh.f32 %v224_v14  ;;  %869 = vmatprep.mubr.bf16.mxu1 %v333_v15  ;;  %v245_v41 = vadd.f32 %v835_v16, %v1264_v58 }
  0xe8   :  { %952 = vtanh.f32 %v229_v4  ;;  %v236_v22 = vpop.f32.mrf.mxu0  ;;  %870 = vmatmul.mubr.bf16.vlgmr.msra.gmra.mxu1 %v334_v19  ;;  %v939_v28 = vpop.eup %938 }
  0xe9   :  { %v237_v23 = vadd.f32 %v1264_v58, %v236_v22 }
  0xea   :  { %v836_v29 = vpop.f32.mrf.mxu0  ;;  %v941_v34 = vpop.eup %940 }
  0xeb   :  { %v248_v35 = vadd.f32 %v836_v29, %v1264_v58  ;;  %954 = vtanh.f32 %v237_v23 }
  0xec   :  { %v943_v40 = vpop.eup %942  ;;  %v239_v46 = vpop.f32.mrf.mxu0 }
  0xed   :  { %v945_v47 = vpop.eup %944  ;;  %v240_v50 = vadd.f32 %v1264_v58, %v239_v46  ;;  %v335_v51 = vpack.c.bf16 %v943_v40, %v939_v28  ;;  %956 = vtanh.f32 %v248_v35 }
  0xee   :  { %v839_v52 = vpop.f32.mrf.mxu0  ;;  %v336_v53 = vpack.c.bf16 %v941_v34, %v945_v47 }
  0xef   :  { %958 = vtanh.f32 %v240_v50  ;;  %873 = vmatprep.mubr.bf16.mxu1 %v335_v51  ;;  %v261_v62 = vadd.f32 %v839_v52, %v1264_v58 }
  0xf0   :  { %960 = vtanh.f32 %v245_v41  ;;  %v252_v54 = vpop.f32.mrf.mxu0  ;;  %874 = vmatmul.mubr.bf16.gmra.mxu1 %v336_v53  ;;  %v947_v56 = vpop.eup %946 }
  0xf1   :  { %v253_v55 = vadd.f32 %v1264_v58, %v252_v54 }
  0xf2   :  { %v840_v57 = vpop.f32.mrf.mxu0  ;;  %v949_v59 = vpop.eup %948 }
  0xf3   :  { %v264_v60 = vadd.f32 %v840_v57, %v1264_v58  ;;  %962 = vtanh.f32 %v253_v55 }
  0xf4   :  { %v951_v61 = vpop.eup %950  ;;  %v255_v63 = vpop.f32.mrf.mxu0 }
  0xf5   :  { %v953_v0 = vpop.eup %952  ;;  %v256_v4 = vadd.f32 %v1264_v58, %v255_v63  ;;  %v337_v8 = vpack.c.bf16 %v951_v61, %v947_v56  ;;  %964 = vtanh.f32 %v264_v60 }
  0xf6   :  { %v843_v9 = vpop.f32.mrf.mxu0  ;;  %v338_v14 = vpack.c.bf16 %v949_v59, %v953_v0 }
  0xf7   :  { %966 = vtanh.f32 %v256_v4  ;;  %877 = vmatprep.mubr.bf16.mxu1 %v337_v8  ;;  %v277_v34 = vadd.f32 %v843_v9, %v1264_v58 }
  0xf8   :  { %968 = vtanh.f32 %v261_v62  ;;  %v268_v15 = vpop.f32.mrf.mxu0  ;;  %878 = vmatmul.mubr.bf16.gmra.mxu1 %v338_v14  ;;  %v955_v19 = vpop.eup %954 }
  0xf9   :  { %v269_v16 = vadd.f32 %v1264_v58, %v268_v15 }
  0xfa   :  { %v844_v22 = vpop.f32.mrf.mxu0  ;;  %v957_v23 = vpop.eup %956 }
  0xfb   :  { %v280_v28 = vadd.f32 %v844_v22, %v1264_v58  ;;  %970 = vtanh.f32 %v269_v16 }
  0xfc   :  { %v959_v29 = vpop.eup %958  ;;  %v271_v35 = vpop.f32.mrf.mxu0 }
  0xfd   :  { %v961_v40 = vpop.eup %960  ;;  %v272_v41 = vadd.f32 %v1264_v58, %v271_v35  ;;  %v339_v46 = vpack.c.bf16 %v959_v29, %v955_v19  ;;  %972 = vtanh.f32 %v280_v28 }
  0xfe   :  { %v847_v47 = vpop.f32.mrf.mxu0  ;;  %v340_v50 = vpack.c.bf16 %v957_v23, %v961_v40 }
  0xff   :  { %974 = vtanh.f32 %v272_v41  ;;  %881 = vmatprep.mubr.bf16.mxu1 %v339_v46  ;;  %v293_v59 = vadd.f32 %v847_v47, %v1264_v58  ;;  %v645_v41 = vld [vmem:[%s1724_s1 + $0x10] sm:$0xff] }
 0x100   :  { %976 = vtanh.f32 %v277_v34  ;;  %v284_v51 = vpop.f32.mrf.mxu0  ;;  %882 = vmatmul.mubr.bf16.gmra.mxu1 %v340_v50  ;;  %v963_v53 = vpop.eup %962  ;;  %v1301_v34 = vld [vmem:[%s1723_s5] ss:$0 sm:$0xff] }
 0x101   :  { %v285_v52 = vadd.f32 %v1264_v58, %v284_v51  ;;  %v643_v51 = vld [vmem:[%s1724_s1] sm:$0xff] }
 0x102   :  { %v848_v54 = vpop.f32.mrf.mxu0  ;;  %v965_v55 = vpop.eup %964 }
 0x103   :  { %v296_v56 = vadd.f32 %v848_v54, %v1264_v58  ;;  %978 = vtanh.f32 %v285_v52 }
 0x104   :  { %v967_v57 = vpop.eup %966  ;;  %v287_v60 = vpop.f32.mrf.mxu0 }
 0x105   :  { %v969_v61 = vpop.eup %968  ;;  %v288_v62 = vadd.f32 %v1264_v58, %v287_v60  ;;  %v341_v63 = vpack.c.bf16 %v967_v57, %v963_v53  ;;  %980 = vtanh.f32 %v296_v56  ;;  %v644_v60 = vld [vmem:[%s1724_s1 + $0x8] sm:$0xff] }
 0x106   :  { %v342_v0 = vpack.c.bf16 %v965_v55, %v969_v61 }
 0x107   :  { %982 = vtanh.f32 %v288_v62  ;;  %885 = vmatprep.mubr.bf16.mxu1 %v341_v63 }
 0x108   :  { %984 = vtanh.f32 %v293_v59  ;;  %886 = vmatmul.mubr.bf16.gmra.mxu1 %v342_v0  ;;  %v971_v4 = vpop.eup %970  ;;  %v649_v0 = vld [vmem:[%s1724_s1 + $0x30] sm:$0xff] }
 0x10a   :  { %v973_v8 = vpop.eup %972 }
 0x10c   :  { %v975_v9 = vpop.eup %974 }
 0x10d   :  { %v977_v14 = vpop.eup %976  ;;  %v343_v15 = vpack.c.bf16 %v975_v9, %v971_v4 }
 0x10e   :  { %v344_v16 = vpack.c.bf16 %v973_v8, %v977_v14  ;;  %v647_v14 = vld [vmem:[%s1724_s1 + $0x20] sm:$0xff] }
 0x10f   :  { %889 = vmatprep.mubr.bf16.mxu1 %v343_v15 }
 0x110   :  { %890 = vmatmul.mubr.bf16.gmra.mxu1 %v344_v16  ;;  %v979_v19 = vpop.eup %978 }
 0x112   :  { %v981_v22 = vpop.eup %980 }
 0x114   :  { %v983_v23 = vpop.eup %982 }
 0x115   :  { %v985_v28 = vpop.eup %984  ;;  %v345_v58 = vpack.c.bf16 %v983_v23, %v979_v19 }
 0x116   :  { %v346_v29 = vpack.c.bf16 %v981_v22, %v985_v28  ;;  %v650_v22 = vld [vmem:[%s1724_s1 + $0x38] sm:$0xff] }
 0x117   :  { %893 = vmatprep.mubr.bf16.mxu1 %v345_v58 }
 0x118   :  { %894 = vmatmul.mubr.bf16.gmra.mxu1 %v346_v29  ;;  %v648_v29 = vld [vmem:[%s1724_s1 + $0x28] sm:$0xff] }
 0x1a0   :  { %v867_v35 = vpop.f32.mrf.mxu0 }
 0x1a1   :  { %v461_v40 = vadd.f32 %v867_v35, %v1301_v34 }
 0x1a2   :  { %v452_v46 = vpop.f32.mrf.mxu0 }
 0x1a3   :  { %581 = vst.msk [vmem:[%s1725_s6 + $0x10] sm:$0xff] %vm89_vm0, %v461_v40  ;;  %v613_v47 = vadd.f32 %v461_v40, %v1042_v3  ;;  %v453_v50 = vadd.f32 %v1301_v34, %v452_v46  ;;  %v646_v3 = vld [vmem:[%s1724_s1 + $0x18] sm:$0xff]  ;;  %v653_v46 = vld [vmem:[%s1724_s1 + $0x50] sm:$0xff] }
 0x1a4   :  { %v868_v52 = vpop.f32.mrf.mxu0 }
 0x1a5   :  { %v677_v53 = vadd.f32 %v645_v41, %v613_v47  ;;  %579 = vst.msk [vmem:[%s1725_s6] sm:$0xff] %vm89_vm0, %v453_v50  ;;  %v611_v54 = vadd.f32 %v453_v50, %v1032_v1  ;;  %v464_v55 = vadd.f32 %v868_v52, %v1301_v34  ;;  %v651_v52 = vld [vmem:[%s1724_s1 + $0x40] sm:$0xff] }
 0x1a6   :  { %v455_v56 = vpop.f32.mrf.mxu0 }
 0x1a7   :  { %709 = vst.msk [vmem:[%s1726_s7 + $0x10] sm:$0xff] %vm89_vm0, %v677_v53  ;;  %v675_v57 = vadd.f32 %v643_v51, %v611_v54  ;;  %582 = vst.msk [vmem:[%s1725_s6 + $0x18] sm:$0xff] %vm89_vm0, %v464_v55  ;;  %v614_v1 = vadd.f32 %v464_v55, %v1049_v5  ;;  %v456_v59 = vadd.f32 %v1301_v34, %v455_v56 }
 0x1a8   :  { %v871_v61 = vpop.f32.mrf.mxu1 }
 0x1a9   :  { %707 = vst.msk [vmem:[%s1726_s7] sm:$0xff] %vm89_vm0, %v675_v57  ;;  %v678_v62 = vadd.f32 %v646_v3, %v614_v1  ;;  %580 = vst.msk [vmem:[%s1725_s6 + $0x8] sm:$0xff] %vm89_vm0, %v456_v59  ;;  %v612_v5 = vadd.f32 %v456_v59, %v1037_v2  ;;  %v477_v63 = vadd.f32 %v871_v61, %v1301_v34  ;;  %v654_v3 = vld [vmem:[%s1724_s1 + $0x58] sm:$0xff]  ;;  %v652_v59 = vld [vmem:[%s1724_s1 + $0x48] sm:$0xff] }
 0x1aa   :  { %v468_v4 = vpop.f32.mrf.mxu1 }
 0x1ab   :  { %710 = vst.msk [vmem:[%s1726_s7 + $0x18] sm:$0xff] %vm89_vm0, %v678_v62  ;;  %v676_v8 = vadd.f32 %v644_v60, %v612_v5  ;;  %585 = vst.msk [vmem:[%s1725_s6 + $0x30] sm:$0xff] %vm89_vm0, %v477_v63  ;;  %v617_v2 = vadd.f32 %v477_v63, %v1071_v10  ;;  %v469_v9 = vadd.f32 %v1301_v34, %v468_v4  ;;  %v657_v5 = vld [vmem:[%s1724_s1 + $0x70] sm:$0xff] }
 0x1ac   :  { %v872_v15 = vpop.f32.mrf.mxu1 }
 0x1ad   :  { %708 = vst.msk [vmem:[%s1726_s7 + $0x8] sm:$0xff] %vm89_vm0, %v676_v8  ;;  %v681_v16 = vadd.f32 %v649_v0, %v617_v2  ;;  %583 = vst.msk [vmem:[%s1725_s6 + $0x20] sm:$0xff] %vm89_vm0, %v469_v9  ;;  %v615_v10 = vadd.f32 %v469_v9, %v1054_v6  ;;  %v480_v19 = vadd.f32 %v872_v15, %v1301_v34  ;;  %v655_v8 = vld [vmem:[%s1724_s1 + $0x60] sm:$0xff]  ;;  %v658_v15 = vld [vmem:[%s1724_s1 + $0x78] sm:$0xff] }
 0x1ae   :  { %v471_v23 = vpop.f32.mrf.mxu1 }
 0x1af   :  { %713 = vst.msk [vmem:[%s1726_s7 + $0x30] sm:$0xff] %vm89_vm0, %v681_v16  ;;  %v679_v28 = vadd.f32 %v647_v14, %v615_v10  ;;  %586 = vst.msk [vmem:[%s1725_s6 + $0x38] sm:$0xff] %vm89_vm0, %v480_v19  ;;  %v618_v6 = vadd.f32 %v480_v19, %v1076_v11  ;;  %v472_v58 = vadd.f32 %v1301_v34, %v471_v23 }
 0x1b0   :  { %v875_v35 = vpop.f32.mrf.mxu1 }
 0x1b1   :  { %711 = vst.msk [vmem:[%s1726_s7 + $0x20] sm:$0xff] %vm89_vm0, %v679_v28  ;;  %v682_v40 = vadd.f32 %v650_v22, %v618_v6  ;;  %584 = vst.msk [vmem:[%s1725_s6 + $0x28] sm:$0xff] %vm89_vm0, %v472_v58  ;;  %v616_v11 = vadd.f32 %v472_v58, %v1059_v7  ;;  %v493_v41 = vadd.f32 %v875_v35, %v1301_v34  ;;  %v656_v22 = vld [vmem:[%s1724_s1 + $0x68] sm:$0xff]  ;;  %v661_v58 = vld [vmem:[%s1724_s1 + $0x90] sm:$0xff] }
 0x1b2   :  { %v484_v47 = vpop.f32.mrf.mxu1 }
 0x1b3   :  { %714 = vst.msk [vmem:[%s1726_s7 + $0x38] sm:$0xff] %vm89_vm0, %v682_v40  ;;  %v680_v50 = vadd.f32 %v648_v29, %v616_v11  ;;  %589 = vst.msk [vmem:[%s1725_s6 + $0x50] sm:$0xff] %vm89_vm0, %v493_v41  ;;  %v621_v7 = vadd.f32 %v493_v41, %v1098_v17  ;;  %v485_v51 = vadd.f32 %v1301_v34, %v484_v47  ;;  %v659_v11 = vld [vmem:[%s1724_s1 + $0x80] sm:$0xff] }
 0x1b4   :  { %v876_v53 = vpop.f32.mrf.mxu1 }
 0x1b5   :  { %712 = vst.msk [vmem:[%s1726_s7 + $0x28] sm:$0xff] %vm89_vm0, %v680_v50  ;;  %v685_v54 = vadd.f32 %v653_v46, %v621_v7  ;;  %587 = vst.msk [vmem:[%s1725_s6 + $0x40] sm:$0xff] %vm89_vm0, %v485_v51  ;;  %v619_v17 = vadd.f32 %v485_v51, %v1081_v12  ;;  %v496_v55 = vadd.f32 %v876_v53, %v1301_v34  ;;  %v662_v50 = vld [vmem:[%s1724_s1 + $0x98] sm:$0xff]  ;;  %v660_v53 = vld [vmem:[%s1724_s1 + $0x88] sm:$0xff] }
 0x1b6   :  { %v487_v56 = vpop.f32.mrf.mxu1 }
 0x1b7   :  { %717 = vst.msk [vmem:[%s1726_s7 + $0x50] sm:$0xff] %vm89_vm0, %v685_v54  ;;  %v683_v57 = vadd.f32 %v651_v52, %v619_v17  ;;  %590 = vst.msk [vmem:[%s1725_s6 + $0x58] sm:$0xff] %vm89_vm0, %v496_v55  ;;  %v622_v12 = vadd.f32 %v496_v55, %v1103_v18  ;;  %v488_v1 = vadd.f32 %v1301_v34, %v487_v56 }
 0x1b8   :  { %v879_v60 = vpop.f32.mrf.mxu1 }
 0x1b9   :  { %715 = vst.msk [vmem:[%s1726_s7 + $0x40] sm:$0xff] %vm89_vm0, %v683_v57  ;;  %v686_v61 = vadd.f32 %v654_v3, %v622_v12  ;;  %588 = vst.msk [vmem:[%s1725_s6 + $0x48] sm:$0xff] %vm89_vm0, %v488_v1  ;;  %v620_v18 = vadd.f32 %v488_v1, %v1086_v13  ;;  %v509_v62 = vadd.f32 %v879_v60, %v1301_v34  ;;  %v665_v3 = vld [vmem:[%s1724_s1 + $0xb0] sm:$0xff]  ;;  %v663_v1 = vld [vmem:[%s1724_s1 + $0xa0] sm:$0xff] }
 0x1ba   :  { %v500_v63 = vpop.f32.mrf.mxu1 }
 0x1bb   :  { %718 = vst.msk [vmem:[%s1726_s7 + $0x58] sm:$0xff] %vm89_vm0, %v686_v61  ;;  %v684_v0 = vadd.f32 %v652_v59, %v620_v18  ;;  %593 = vst.msk [vmem:[%s1725_s6 + $0x70] sm:$0xff] %vm89_vm0, %v509_v62  ;;  %v625_v13 = vadd.f32 %v509_v62, %v1129_v24  ;;  %v501_v4 = vadd.f32 %v1301_v34, %v500_v63  ;;  %v666_v18 = vld [vmem:[%s1724_s1 + $0xb8] sm:$0xff] }
 0x1bc   :  { %v880_v2 = vpop.f32.mrf.mxu1 }
 0x1bd   :  { %716 = vst.msk [vmem:[%s1726_s7 + $0x48] sm:$0xff] %vm89_vm0, %v684_v0  ;;  %v689_v9 = vadd.f32 %v657_v5, %v625_v13  ;;  %591 = vst.msk [vmem:[%s1725_s6 + $0x60] sm:$0xff] %vm89_vm0, %v501_v4  ;;  %v623_v24 = vadd.f32 %v501_v4, %v1112_v20  ;;  %v512_v14 = vadd.f32 %v880_v2, %v1301_v34  ;;  %v664_v0 = vld [vmem:[%s1724_s1 + $0xa8] sm:$0xff]  ;;  %v669_v2 = vld [vmem:[%s1724_s1 + $0xd0] sm:$0xff] }
 0x1be   :  { %v503_v16 = vpop.f32.mrf.mxu1 }
 0x1bf   :  { %721 = vst.msk [vmem:[%s1726_s7 + $0x70] sm:$0xff] %vm89_vm0, %v689_v9  ;;  %v687_v10 = vadd.f32 %v655_v8, %v623_v24  ;;  %594 = vst.msk [vmem:[%s1725_s6 + $0x78] sm:$0xff] %vm89_vm0, %v512_v14  ;;  %v626_v20 = vadd.f32 %v512_v14, %v1134_v25  ;;  %v504_v19 = vadd.f32 %v1301_v34, %v503_v16 }
 0x1c0   :  { %v883_v23 = vpop.f32.mrf.mxu1 }
 0x1c1   :  { %719 = vst.msk [vmem:[%s1726_s7 + $0x60] sm:$0xff] %vm89_vm0, %v687_v10  ;;  %v690_v28 = vadd.f32 %v658_v15, %v626_v20  ;;  %592 = vst.msk [vmem:[%s1725_s6 + $0x68] sm:$0xff] %vm89_vm0, %v504_v19  ;;  %v624_v25 = vadd.f32 %v504_v19, %v1117_v21  ;;  %v525_v6 = vadd.f32 %v883_v23, %v1301_v34  ;;  %v667_v15 = vld [vmem:[%s1724_s1 + $0xc0] sm:$0xff]  ;;  %v670_v19 = vld [vmem:[%s1724_s1 + $0xd8] sm:$0xff] }
 0x1c2   :  { %v516_v29 = vpop.f32.mrf.mxu1 }
 0x1c3   :  { %722 = vst.msk [vmem:[%s1726_s7 + $0x78] sm:$0xff] %vm89_vm0, %v690_v28  ;;  %v688_v35 = vadd.f32 %v656_v22, %v624_v25  ;;  %597 = vst.msk [vmem:[%s1725_s6 + $0x90] sm:$0xff] %vm89_vm0, %v525_v6  ;;  %v629_v21 = vadd.f32 %v525_v6, %v1155_v30  ;;  %v517_v40 = vadd.f32 %v1301_v34, %v516_v29  ;;  %v668_v25 = vld [vmem:[%s1724_s1 + $0xc8] sm:$0xff] }
 0x1c4   :  { %v884_v41 = vpop.f32.mrf.mxu1 }
 0x1c5   :  { %720 = vst.msk [vmem:[%s1726_s7 + $0x68] sm:$0xff] %vm89_vm0, %v688_v35  ;;  %v693_v46 = vadd.f32 %v661_v58, %v629_v21  ;;  %595 = vst.msk [vmem:[%s1725_s6 + $0x80] sm:$0xff] %vm89_vm0, %v517_v40  ;;  %v627_v30 = vadd.f32 %v517_v40, %v1139_v26  ;;  %v528_v47 = vadd.f32 %v884_v41, %v1301_v34  ;;  %v673_v35 = vld [vmem:[%s1724_s1 + $0xf0] sm:$0xff]  ;;  %v671_v41 = vld [vmem:[%s1724_s1 + $0xe0] sm:$0xff] }
 0x1c6   :  { %v519_v7 = vpop.f32.mrf.mxu1 }
 0x1c7   :  { %725 = vst.msk [vmem:[%s1726_s7 + $0x90] sm:$0xff] %vm89_vm0, %v693_v46  ;;  %v691_v51 = vadd.f32 %v659_v11, %v627_v30  ;;  %598 = vst.msk [vmem:[%s1725_s6 + $0x98] sm:$0xff] %vm89_vm0, %v528_v47  ;;  %v630_v26 = vadd.f32 %v528_v47, %v1160_v31  ;;  %v520_v52 = vadd.f32 %v1301_v34, %v519_v7 }
 0x1c8   :  { %v887_v54 = vpop.f32.mrf.mxu1 }
 0x1c9   :  { %723 = vst.msk [vmem:[%s1726_s7 + $0x80] sm:$0xff] %vm89_vm0, %v691_v51  ;;  %v694_v17 = vadd.f32 %v662_v50, %v630_v26  ;;  %596 = vst.msk [vmem:[%s1725_s6 + $0x88] sm:$0xff] %vm89_vm0, %v520_v52  ;;  %v628_v31 = vadd.f32 %v520_v52, %v1144_v27  ;;  %v541_v55 = vadd.f32 %v887_v54, %v1301_v34  ;;  %v674_v50 = vld [vmem:[%s1724_s1 + $0xf8] sm:$0xff]  ;;  %v672_v52 = vld [vmem:[%s1724_s1 + $0xe8] sm:$0xff] }
 0x1ca   :  { %v532_v56 = vpop.f32.mrf.mxu1 }
 0x1cb   :  { %726 = vst.msk [vmem:[%s1726_s7 + $0x98] sm:$0xff] %vm89_vm0, %v694_v17  ;;  %v692_v57 = vadd.f32 %v660_v53, %v628_v31  ;;  %601 = vst.msk [vmem:[%s1725_s6 + $0xb0] sm:$0xff] %vm89_vm0, %v541_v55  ;;  %v633_v27 = vadd.f32 %v541_v55, %v1181_v36  ;;  %v533_v12 = vadd.f32 %v1301_v34, %v532_v56 }
 0x1cc   :  { %v888_v59 = vpop.f32.mrf.mxu1 }
 0x1cd   :  { %724 = vst.msk [vmem:[%s1726_s7 + $0x88] sm:$0xff] %vm89_vm0, %v692_v57  ;;  %v697_v60 = vadd.f32 %v665_v3, %v633_v27  ;;  %599 = vst.msk [vmem:[%s1725_s6 + $0xa0] sm:$0xff] %vm89_vm0, %v533_v12  ;;  %v631_v36 = vadd.f32 %v533_v12, %v1165_v32  ;;  %v544_v61 = vadd.f32 %v888_v59, %v1301_v34 }
 0x1ce   :  { %v535_v62 = vpop.f32.mrf.mxu1 }
 0x1cf   :  { %729 = vst.msk [vmem:[%s1726_s7 + $0xb0] sm:$0xff] %vm89_vm0, %v697_v60  ;;  %v695_v5 = vadd.f32 %v663_v1, %v631_v36  ;;  %602 = vst.msk [vmem:[%s1725_s6 + $0xb8] sm:$0xff] %vm89_vm0, %v544_v61  ;;  %v634_v32 = vadd.f32 %v544_v61, %v1186_v37  ;;  %v536_v63 = vadd.f32 %v1301_v34, %v535_v62 }
 0x1d0   :  { %v891_v13 = vpop.f32.mrf.mxu1 }
 0x1d1   :  { %727 = vst.msk [vmem:[%s1726_s7 + $0xa0] sm:$0xff] %vm89_vm0, %v695_v5  ;;  %v698_v4 = vadd.f32 %v666_v18, %v634_v32  ;;  %600 = vst.msk [vmem:[%s1725_s6 + $0xa8] sm:$0xff] %vm89_vm0, %v536_v63  ;;  %v632_v37 = vadd.f32 %v536_v63, %v1170_v33  ;;  %v557_v8 = vadd.f32 %v891_v13, %v1301_v34 }
 0x1d2   :  { %v548_v9 = vpop.f32.mrf.mxu1 }
 0x1d3   :  { %730 = vst.msk [vmem:[%s1726_s7 + $0xb8] sm:$0xff] %vm89_vm0, %v698_v4  ;;  %v696_v24 = vadd.f32 %v664_v0, %v632_v37  ;;  %605 = vst.msk [vmem:[%s1725_s6 + $0xd0] sm:$0xff] %vm89_vm0, %v557_v8  ;;  %v637_v33 = vadd.f32 %v557_v8, %v1207_v42  ;;  %v549_v14 = vadd.f32 %v1301_v34, %v548_v9 }
 0x1d4   :  { %v892_v16 = vpop.f32.mrf.mxu1 }
 0x1d5   :  { %728 = vst.msk [vmem:[%s1726_s7 + $0xa8] sm:$0xff] %vm89_vm0, %v696_v24  ;;  %v701_v10 = vadd.f32 %v669_v2, %v637_v33  ;;  %603 = vst.msk [vmem:[%s1725_s6 + $0xc0] sm:$0xff] %vm89_vm0, %v549_v14  ;;  %v635_v42 = vadd.f32 %v549_v14, %v1191_v38  ;;  %v560_v20 = vadd.f32 %v892_v16, %v1301_v34 }
 0x1d6   :  { %v551_v22 = vpop.f32.mrf.mxu1 }
 0x1d7   :  { %733 = vst.msk [vmem:[%s1726_s7 + $0xd0] sm:$0xff] %vm89_vm0, %v701_v10  ;;  %v699_v23 = vadd.f32 %v667_v15, %v635_v42  ;;  %606 = vst.msk [vmem:[%s1725_s6 + $0xd8] sm:$0xff] %vm89_vm0, %v560_v20  ;;  %v638_v38 = vadd.f32 %v560_v20, %v1212_v43  ;;  %v552_v28 = vadd.f32 %v1301_v34, %v551_v22 }
 0x1d8   :  { %v895_v6 = vpop.f32.mrf.mxu1 }
 0x1d9   :  { %731 = vst.msk [vmem:[%s1726_s7 + $0xc0] sm:$0xff] %vm89_vm0, %v699_v23  ;;  %v702_v58 = vadd.f32 %v670_v19, %v638_v38  ;;  %604 = vst.msk [vmem:[%s1725_s6 + $0xc8] sm:$0xff] %vm89_vm0, %v552_v28  ;;  %v636_v43 = vadd.f32 %v552_v28, %v1196_v39  ;;  %v573_v29 = vadd.f32 %v895_v6, %v1301_v34 }
 0x1da   :  { %v564_v21 = vpop.f32.mrf.mxu1 }
 0x1db   :  { %734 = vst.msk [vmem:[%s1726_s7 + $0xd8] sm:$0xff] %vm89_vm0, %v702_v58  ;;  %v700_v40 = vadd.f32 %v668_v25, %v636_v43  ;;  %609 = vst.msk [vmem:[%s1725_s6 + $0xf0] sm:$0xff] %vm89_vm0, %v573_v29  ;;  %v641_v39 = vadd.f32 %v573_v29, %v1233_v48  ;;  %v565_v11 = vadd.f32 %v1301_v34, %v564_v21 }
 0x1dc   :  { %v896_v46 = vpop.f32.mrf.mxu1 }
 0x1dd   :  { %732 = vst.msk [vmem:[%s1726_s7 + $0xc8] sm:$0xff] %vm89_vm0, %v700_v40  ;;  %v705_v30 = vadd.f32 %v673_v35, %v641_v39  ;;  %607 = vst.msk [vmem:[%s1725_s6 + $0xe0] sm:$0xff] %vm89_vm0, %v565_v11  ;;  %v639_v48 = vadd.f32 %v565_v11, %v1217_v44  ;;  %v576_v47 = vadd.f32 %v896_v46, %v1301_v34 }
 0x1de   :  { %v567_v7 = vpop.f32.mrf.mxu1 }
 0x1df   :  { %737 = vst.msk [vmem:[%s1726_s7 + $0xf0] sm:$0xff] %vm89_vm0, %v705_v30  ;;  %v703_v51 = vadd.f32 %v671_v41, %v639_v48  ;;  %610 = vst.msk [vmem:[%s1725_s6 + $0xf8] sm:$0xff] %vm89_vm0, %v576_v47  ;;  %v642_v44 = vadd.f32 %v576_v47, %v1238_v49  ;;  %v568_v26 = vadd.f32 %v1301_v34, %v567_v7 }
 0x1e1   :  { %735 = vst.msk [vmem:[%s1726_s7 + $0xe0] sm:$0xff] %vm89_vm0, %v703_v51  ;;  %v706_v53 = vadd.f32 %v674_v50, %v642_v44  ;;  %608 = vst.msk [vmem:[%s1725_s6 + $0xe8] sm:$0xff] %vm89_vm0, %v568_v26  ;;  %v640_v54 = vadd.f32 %v568_v26, %v1222_v45 }
 0x1e3   :  { %738 = vst.msk [vmem:[%s1726_s7 + $0xf8] sm:$0xff] %vm89_vm0, %v706_v53  ;;  %v704_v49 = vadd.f32 %v672_v52, %v640_v54 }
 0x1e5   :  { %736 = vst.msk [vmem:[%s1726_s7 + $0xe8] sm:$0xff] %vm89_vm0, %v704_v49 }

</bundles_post_ra>
